<compile_context>
chip_gen: v7x
topology: tpu7x:2x2x1
jax: 0.10.0
libtpu: 0.0.40
codegen_flags: <defaults>
</compile_context>

<pallas_src>
import functools

import jax
import jax.numpy as jnp
import numpy as np
from jax.experimental import pallas as pl
from jax.experimental.pallas import tpu as pltpu

EPS = 1e-5


def _round_up(x, m):
    return ((x + m - 1) // m) * m


def _pick_tile(dim, target, mult):
    """Largest divisor of `dim` that is a multiple of `mult` and <= max(target, mult).
    Falls back to the full dim (always a legal full-extent block); the VMEM request is
    computed from the tiles actually chosen, so a fallback cannot silently exceed it.
    TODO(synk): pad awkward (e.g. prime) dims up to a tileable multiple instead."""
    for cand in range(min(dim, max(target, mult)), 0, -1):
        if dim % cand == 0 and cand % mult == 0:
            return cand
    return dim


def _vmem_budget_bytes():
    """Per-generation VMEM request ceiling: ~100 MiB on v5e/v6e (128 MiB physical),
    48 MiB on v7x (64 MiB physical).  Falls back to the v7x-safe 48 MiB."""
    cap = 64 * 2**20
    try:
        info = pltpu.get_tpu_info()
        cap = int(getattr(info, "vmem_capacity_bytes", cap) or cap)
    except Exception:
        pass
    return int(min(max(cap - 16 * 2**20, 32 * 2**20), 100 * 2**20))


def _vmem_limit(working_set_bytes, budget):
    return int(min(max(4 * working_set_bytes, 8 * 2**20), budget))


# ---------------------------------------------------------------------------
# Pass 1: conv-as-matmul on the MXU (bf16 in / f32 acc), tiled over (F, M).
# Emits bf16 conv activations (halves the dominant inter-pass HBM stream) and
# per-tile partial BatchNorm2d statistics, so BOTH grid axes are "parallel"
# (v7x megacore); the tiny cross-tile stats reduction happens in XLA.
# ---------------------------------------------------------------------------
def _conv_stats_kernel(patches_ref, wconv_ref, conv_ref, psum_ref, pssq_ref):
    acc = jnp.dot(patches_ref[...], wconv_ref[...],
                  preferred_element_type=jnp.float32)            # [tm, tf] f32
    cb = acc.astype(jnp.bfloat16)
    conv_ref[...] = cb                                           # bf16 activations for pass 2
    c = cb.astype(jnp.float32)                                   # stats from stored values
    psum_ref[...] = jnp.sum(c, axis=0, keepdims=True).reshape(psum_ref.shape)
    pssq_ref[...] = jnp.sum(c * c, axis=0, keepdims=True).reshape(pssq_ref.shape)


# ---------------------------------------------------------------------------
# Pass 2: fused BN2d-normalize + ReLU + global average pool.
# scale/shift are precomputed in XLA with 1/P folded in, so the body is a single
# fused mul-add + max + sublane reduce; the pooled [tn, F_pad] output block stays
# resident across the P (reduction, last) axis.
# ---------------------------------------------------------------------------
def _bn_relu_pool_kernel(conv_ref, scale_ref, shift_ref, pooled_ref):
    h = conv_ref[...].astype(jnp.float32) * scale_ref[...] + shift_ref[...]
    h = jnp.maximum(h, 0.0)                                      # [tn, tp, F_pad]
    part = jnp.sum(h, axis=1)                                    # [tn, F_pad]

    @pl.when(pl.program_id(1) == 0)
    def _init():
        pooled_ref[...] = jnp.zeros_like(pooled_ref)

    pooled_ref[...] += part


# ---------------------------------------------------------------------------
# Pass 3: MLP head on the pooled [N, hidden] features (lane-dense, padded to 128).
# Linear -> ReLU -> BN1d(affine) -> Linear -> BN1d(no affine), one-pass variances.
# ---------------------------------------------------------------------------
def _mlp_head_kernel(pooled_ref, w1_ref, b1_ref, g1_ref, be1_ref, w2_ref, b2_ref,
                     out_ref):
    y = jnp.dot(pooled_ref[...], w1_ref[...],
                preferred_element_type=jnp.float32) + b1_ref[...]
    y = jnp.maximum(y, 0.0)
    mu1 = jnp.mean(y, axis=0, keepdims=True)
    var1 = jnp.mean(y * y, axis=0, keepdims=True) - mu1 * mu1
    y = (y - mu1) * jax.lax.rsqrt(var1 + EPS) * g1_ref[...] + be1_ref[...]

    z = jnp.dot(y, w2_ref[...],
                preferred_element_type=jnp.float32) + b2_ref[...]
    mu2 = jnp.mean(z, axis=0, keepdims=True)
    var2 = jnp.mean(z * z, axis=0, keepdims=True) - mu2 * mu2
    out_ref[...] = (z - mu2) * jax.lax.rsqrt(var2 + EPS)


@functools.partial(jax.jit,
                   static_argnames=("block_m", "block_p", "block_n", "block_f"))
def projection_resfc_forward(x, params, *, block_m=None, block_p=None,
                             block_n=8, block_f=512):
    """x: [N, C, H, W] float32 (NCHW).  Returns [N, out_dim] float32 (train-mode BN)."""
    N, C, H, W = x.shape
    Ho = (H - 1) // 2 + 1
    Wo = (W - 1) // 2 + 1
    P = Ho * Wo
    M = N * P

    hidden = params["w_conv"].shape[0]
    out_dim = params["w2"].shape[0]

    K = C * 9
    # No 128-padding of K when it is small: a full-extent last-dim block is legal and
    # padding would inflate the patches HBM array / MXU K loop with zeros.
    K_p = K if K <= 128 else _round_up(K, 128)
    F_pad = _round_up(hidden, 128)
    O_pad = _round_up(out_dim, 128)

    budget = _vmem_budget_bytes()
    if block_m is None:                        # generation-aware defaults
        block_m = 512 if budget >= 96 * 2**20 else 256
    if block_p is None:                        # target ~2 MiB conv tile per pass-2 step
        block_p = max(16, (2 * 2**20) // max(1, block_n * F_pad * 2))

    # ---- glue: im2col (pad=1, stride=2, 3x3), built in bf16 so the 9x-expanded
    # intermediates are never materialized in f32.
    xb = x.astype(jnp.bfloat16)
    xp = jnp.pad(xb, ((0, 0), (0, 0), (1, 1), (1, 1)))
    wins = jnp.stack(
        [xp[:, :, dh:dh + 2 * Ho - 1:2, dw:dw + 2 * Wo - 1:2]
         for dh in range(3) for dw in range(3)],
        axis=2)                                                  # [N, C, 9, Ho, Wo] bf16
    patches = wins.transpose(0, 3, 4, 1, 2).reshape(M, K)        # rows (n,h,w), cols (c,kh,kw)
    if K_p != K:
        patches = jnp.pad(patches, ((0, 0), (0, K_p - K)))

    # conv weight [hidden, C, 3, 3] -> [K, hidden] -> zero-padded [K_p, F_pad] bf16
    w_conv = params["w_conv"].reshape(hidden, K).T
    w_conv = jnp.pad(w_conv, ((0, K_p - K), (0, F_pad - hidden))).astype(jnp.bfloat16)

    # Padded channels use gamma=0 (NOT 1) so they stay exactly 0 through BN/ReLU/Linear.
    gamma_c = jnp.pad(params["gamma_c"], (0, F_pad - hidden)).reshape(1, F_pad).astype(jnp.float32)
    beta_c = jnp.pad(params["beta_c"], (0, F_pad - hidden)).reshape(1, F_pad).astype(jnp.float32)

    w1 = jnp.pad(params["w1"].T, ((0, F_pad - hidden), (0, O_pad - out_dim))).astype(jnp.float32)
    b1 = jnp.pad(params["b1"], (0, O_pad - out_dim)).reshape(1, O_pad).astype(jnp.float32)
    g1 = jnp.pad(params["gamma1"], (0, O_pad - out_dim)).reshape(1, O_pad).astype(jnp.float32)
    be1 = jnp.pad(params["beta1"], (0, O_pad - out_dim)).reshape(1, O_pad).astype(jnp.float32)
    w2 = jnp.pad(params["w2"].T, ((0, O_pad - out_dim), (0, O_pad - out_dim))).astype(jnp.float32)
    b2 = jnp.pad(params["b2"], (0, O_pad - out_dim)).reshape(1, O_pad).astype(jnp.float32)

    # ---- tile sizes (divisors of the true dims; sublane-aligned where required) ----
    tm = _pick_tile(M, block_m, 16)            # bf16 second-minor -> multiple of 16
    tf = _pick_tile(F_pad, block_f, 128)       # lane-dense; >=256 at production hidden
    tp = _pick_tile(P, block_p, 16)            # bf16 conv tile second-minor
    tn = _pick_tile(N, block_n, 8)             # f32 pooled second-minor (or full N)
    num_m = M // tm
    num_f = F_pad // tf

    vmem1 = _vmem_limit(tm * K_p * 2 + K_p * tf * 2 + tm * tf * 2 + 4 * tf * 4, budget)
    vmem2 = _vmem_limit(tn * tp * F_pad * 2 + 2 * F_pad * 4 + tn * F_pad * 4, budget)
    vmem3 = _vmem_limit((N * F_pad + F_pad * O_pad + 5 * O_pad + O_pad * O_pad
                         + N * O_pad) * 4, budget)

    # ---- pass 1: conv + per-tile BN statistics (both axes parallel -> megacore OK) ----
    conv_flat, psum, pssq = pl.pallas_call(
        _conv_stats_kernel,
        grid=(num_f, num_m),        # F outermost: the weight block is fetched once per F tile
        in_specs=[
            pl.BlockSpec((tm, K_p), lambda f, m: (m, 0)),
            pl.BlockSpec((K_p, tf), lambda f, m: (0, f)),
            # NOTE: pipeline_mode=pl.Buffered(1) on the weight spec would drop its second
            # buffer; F-tiling already keeps that block small, so it is omitted here.
        ],
        out_specs=[
            pl.BlockSpec((tm, tf), lambda f, m: (m, f)),
            pl.BlockSpec((1, 1, tf), lambda f, m: (m, 0, f)),
            pl.BlockSpec((1, 1, tf), lambda f, m: (m, 0, f)),
        ],
        out_shape=[
            jax.ShapeDtypeStruct((M, F_pad), jnp.bfloat16),
            jax.ShapeDtypeStruct((num_m, 1, F_pad), jnp.float32),
            jax.ShapeDtypeStruct((num_m, 1, F_pad), jnp.float32),
        ],
        compiler_params=pltpu.CompilerParams(
            dimension_semantics=("parallel", "parallel"),
            vmem_limit_bytes=vmem1),
    )(patches, w_conv)
    # TODO(synk): add a K reduction grid axis + f32 VMEM accumulator scratch if K_p grows
    #             very large (>~4K); full-K blocks are fine at current sizes.

    # ---- tiny XLA glue: reduce partial stats, precompute BN2d scale/shift and fold the
    # 1/P pooling factor in (relu(y)*c == relu(y*c) for c > 0).
    col_sum = jnp.sum(psum, axis=0)                              # [1, F_pad]
    col_ssq = jnp.sum(pssq, axis=0)
    mean = col_sum / M
    var = col_ssq / M - mean * mean                              # biased (train-mode)
    scale = gamma_c * jax.lax.rsqrt(var + EPS)
    shift = beta_c - mean * scale
    scale_p = (scale / P).astype(jnp.float32)
    shift_p = (shift / P).astype(jnp.float32)

    # ---- pass 2: normalize + ReLU + per-sample spatial mean pooling ----
    conv3d = conv_flat.reshape(N, P, F_pad)                      # free row-major reshape
    pooled = pl.pallas_call(
        _bn_relu_pool_kernel,
        grid=(N // tn, P // tp),
        in_specs=[
            pl.BlockSpec((tn, tp, F_pad), lambda n, p: (n, p, 0)),
            pl.BlockSpec((1, F_pad), lambda n, p: (0, 0)),
            pl.BlockSpec((1, F_pad), lambda n, p: (0, 0)),
        ],
        out_specs=pl.BlockSpec((tn, F_pad), lambda n, p: (n, 0)),
        out_shape=jax.ShapeDtypeStruct((N, F_pad), jnp.float32),
        compiler_params=pltpu.CompilerParams(
            dimension_semantics=("parallel", "arbitrary"),
            vmem_limit_bytes=vmem2),
    )(conv3d, scale_p, shift_p)

    # ---- pass 3: MLP head (tiny; kept f32 because batch-level train-mode BN amplifies
    # sub-ulp deltas near zero-crossings at small batch) ----
    # TODO(synk): at production out_dim (e.g. 2048) cast the two head matmuls to bf16 and
    #             tile over N with a two-phase BN1d to fit v7x's VMEM budget.
    head_args = (pooled, w1, b1, g1, be1, w2, b2)
    out_pad = pl.pallas_call(
        _mlp_head_kernel,
        grid=(1,),
        in_specs=[pl.BlockSpec(a.shape, lambda i: (0, 0)) for a in head_args],
        out_specs=pl.BlockSpec((N, O_pad), lambda i: (0, 0)),
        out_shape=jax.ShapeDtypeStruct((N, O_pad), jnp.float32),
        compiler_params=pltpu.CompilerParams(
            dimension_semantics=("arbitrary",),
            vmem_limit_bytes=vmem3),
    )(*head_args)

    return out_pad[:, :out_dim]


def reference_forward(x, params):
    """Pure-JAX reference mirroring the PyTorch forward (train-mode BN).  It mirrors the
    kernel's precision policy: bf16 conv matmul with f32 accumulation and bf16 storage of
    the conv activations; everything else is f32."""
    conv = jax.lax.conv_general_dilated(
        x.astype(jnp.bfloat16), params["w_conv"].astype(jnp.bfloat16),
        window_strides=(2, 2), padding=((1, 1), (1, 1)),
        dimension_numbers=("NCHW", "OIHW", "NCHW"),
        preferred_element_type=jnp.float32)
    conv = conv.astype(jnp.bfloat16).astype(jnp.float32)          # kernel stores bf16 activations
    mu = conv.mean(axis=(0, 2, 3), keepdims=True)
    var = ((conv - mu) ** 2).mean(axis=(0, 2, 3), keepdims=True)
    h = (conv - mu) * jax.lax.rsqrt(var + EPS)
    h = h * params["gamma_c"].reshape(1, -1, 1, 1) + params["beta_c"].reshape(1, -1, 1, 1)
    h = jnp.maximum(h, 0.0)
    pooled = h.mean(axis=(2, 3))                                  # [N, hidden]
    y = pooled @ params["w1"].T + params["b1"]
    y = jnp.maximum(y, 0.0)
    mu1 = y.mean(axis=0, keepdims=True)
    v1 = ((y - mu1) ** 2).mean(axis=0, keepdims=True)
    y = (y - mu1) * jax.lax.rsqrt(v1 + EPS) * params["gamma1"] + params["beta1"]
    z = y @ params["w2"].T + params["b2"]
    mu2 = z.mean(axis=0, keepdims=True)
    v2 = ((z - mu2) ** 2).mean(axis=0, keepdims=True)
    return (z - mu2) * jax.lax.rsqrt(v2 + EPS)


if __name__ == "__main__":
    # small shapes consistent with the module
    N, C_in, H, W = 2, 4, 16, 16
    hidden_dim, out_dim = 32, 16

    key = jax.random.PRNGKey(0)
    ks = jax.random.split(key, 9)
    params = {
        "w_conv": 0.1 * jax.random.normal(ks[0], (hidden_dim, C_in, 3, 3), jnp.float32),
        "gamma_c": 1.0 + 0.1 * jax.random.normal(ks[1], (hidden_dim,), jnp.float32),
        "beta_c": 0.1 * jax.random.normal(ks[2], (hidden_dim,), jnp.float32),
        "w1": 0.1 * jax.random.normal(ks[3], (out_dim, hidden_dim), jnp.float32),
        "b1": 0.1 * jax.random.normal(ks[4], (out_dim,), jnp.float32),
        "gamma1": 1.0 + 0.1 * jax.random.normal(ks[5], (out_dim,), jnp.float32),
        "beta1": 0.1 * jax.random.normal(ks[6], (out_dim,), jnp.float32),
        "w2": 0.1 * jax.random.normal(ks[7], (out_dim, out_dim), jnp.float32),
        "b2": 0.05 * jnp.ones((out_dim,), jnp.float32),
    }
    x = jax.random.normal(ks[8], (N, C_in, H, W), jnp.float32)

    # block_m=64 / block_p=32 so the toy M=128, P=64 exercise the multi-tile partial-stat
    # reduction and the resident pooled accumulator across P tiles.
    out = projection_resfc_forward(x, params, block_m=64, block_p=32, block_n=8)
    out = jax.block_until_ready(out)

    ref = jax.block_until_ready(reference_forward(x, params))
    # batch=2 train-mode BN saturates outputs near +/-1; 1e-2 is tight for O(1) outputs.
    np.testing.assert_allclose(np.asarray(out), np.asarray(ref), rtol=1e-2, atol=1e-2)

    print("KERNEL_OK")
</pallas_src>

<mosaic_0001>
module attributes {stable_mosaic.version = 11 : i64} {
  func.func @_conv_stats_kernel(%arg0: i32, %arg1: i32, %arg2: memref<64x36xbf16, #tpu.memory_space<vmem>>, %arg3: memref<36x128xbf16, #tpu.memory_space<vmem>>, %arg4: memref<64x128xbf16, #tpu.memory_space<vmem>>, %arg5: memref<1x1x128xf32, #tpu.memory_space<vmem>>, %arg6: memref<1x1x128xf32, #tpu.memory_space<vmem>>) attributes {dimension_semantics = [#tpu.dimension_semantics<parallel>, #tpu.dimension_semantics<parallel>], iteration_bounds = array<i64: 1, 2>, scalar_prefetch = 0 : i64, scratch_operands = 0 : i64, tpu.core_type = #tpu.core_type<tc>, window_params = [{transform_indices = @transform_0, window_bounds = array<i64: 64, 36>}, {transform_indices = @transform_1, window_bounds = array<i64: 36, 128>}, {transform_indices = @transform_2, window_bounds = array<i64: 64, 128>}, {transform_indices = @transform_3, window_bounds = array<i64: 1, 1, 128>}, {transform_indices = @transform_4, window_bounds = array<i64: 1, 1, 128>}]} {
    %c0 = arith.constant 0 : index
    %c0_0 = arith.constant 0 : index
    %0 = vector.load %arg2[%c0, %c0_0] : memref<64x36xbf16, #tpu.memory_space<vmem>>, vector<64x36xbf16>
    %c0_1 = arith.constant 0 : index
    %c0_2 = arith.constant 0 : index
    %1 = vector.load %arg3[%c0_1, %c0_2] : memref<36x128xbf16, #tpu.memory_space<vmem>>, vector<36x128xbf16>
    %cst = arith.constant dense<0.000000e+00> : vector<64x128xf32>
    %2 = tpu.matmul %0, %1, %cst {dimension_numbers = #tpu.dot_dimension_numbers<[1], [0], [0], [1], [0, 0, 1, 1], [], []>} : vector<64x36xbf16>, vector<36x128xbf16>, vector<64x128xf32> -> vector<64x128xf32>
    %3 = arith.truncf %2 : vector<64x128xf32> to vector<64x128xbf16>
    %c0_3 = arith.constant 0 : index
    %c0_4 = arith.constant 0 : index
    %4 = vector.load %arg4[%c0_3, %c0_4] : memref<64x128xbf16, #tpu.memory_space<vmem>>, vector<64x128xbf16>
    tpu.vector_store %arg4[%c0_3, %c0_4], %3 {strides = array<i32>} : memref<64x128xbf16, #tpu.memory_space<vmem>>, vector<64x128xbf16>,
    %5 = arith.extf %3 : vector<64x128xbf16> to vector<64x128xf32>
    %cst_5 = arith.constant dense<0.000000e+00> : vector<128xf32>
    %6 = vector.multi_reduction <add>, %5, %cst_5 [0] : vector<64x128xf32> to vector<128xf32>
    %7 = vector.shape_cast %6 : vector<128xf32> to vector<1x128xf32>
    %8 = vector.shape_cast %7 : vector<1x128xf32> to vector<1x1x128xf32>
    %c0_6 = arith.constant 0 : index
    %c0_7 = arith.constant 0 : index
    %c0_8 = arith.constant 0 : index
    %9 = vector.load %arg5[%c0_6, %c0_7, %c0_8] : memref<1x1x128xf32, #tpu.memory_space<vmem>>, vector<1x1x128xf32>
    tpu.vector_store %arg5[%c0_6, %c0_7, %c0_8], %8 {strides = array<i32>} : memref<1x1x128xf32, #tpu.memory_space<vmem>>, vector<1x1x128xf32>,
    %10 = arith.mulf %5, %5 : vector<64x128xf32>
    %cst_9 = arith.constant dense<0.000000e+00> : vector<128xf32>
    %11 = vector.multi_reduction <add>, %10, %cst_9 [0] : vector<64x128xf32> to vector<128xf32>
    %12 = vector.shape_cast %11 : vector<128xf32> to vector<1x128xf32>
    %13 = vector.shape_cast %12 : vector<1x128xf32> to vector<1x1x128xf32>
    %c0_10 = arith.constant 0 : index
    %c0_11 = arith.constant 0 : index
    %c0_12 = arith.constant 0 : index
    %14 = vector.load %arg6[%c0_10, %c0_11, %c0_12] : memref<1x1x128xf32, #tpu.memory_space<vmem>>, vector<1x1x128xf32>
    tpu.vector_store %arg6[%c0_10, %c0_11, %c0_12], %13 {strides = array<i32>} : memref<1x1x128xf32, #tpu.memory_space<vmem>>, vector<1x1x128xf32>,
    return
  }
  func.func @transform_0(%arg0: i32, %arg1: i32) -> (i32, i32) {
    %c0_i32 = arith.constant 0 : i32
    %c0_i32_0 = arith.constant 0 : i32
    return %arg1, %c0_i32 : i32, i32
  }
  func.func @transform_1(%arg0: i32, %arg1: i32) -> (i32, i32) {
    %c0_i32 = arith.constant 0 : i32
    %c0_i32_0 = arith.constant 0 : i32
    return %c0_i32, %arg0 : i32, i32
  }
  func.func @transform_2(%arg0: i32, %arg1: i32) -> (i32, i32) {
    %c0_i32 = arith.constant 0 : i32
    return %arg1, %arg0 : i32, i32
  }
  func.func @transform_3(%arg0: i32, %arg1: i32) -> (i32, i32, i32) {
    %c0_i32 = arith.constant 0 : i32
    %c0_i32_0 = arith.constant 0 : i32
    return %arg1, %c0_i32, %arg0 : i32, i32, i32
  }
  func.func @transform_4(%arg0: i32, %arg1: i32) -> (i32, i32, i32) {
    %c0_i32 = arith.constant 0 : i32
    %c0_i32_0 = arith.constant 0 : i32
    return %arg1, %c0_i32, %arg0 : i32, i32, i32
  }
}

module attributes {stable_mosaic.version = 11 : i64} {
  func.func @_bn_relu_pool_kernel(%arg0: i32, %arg1: i32, %arg2: memref<2x32x128xbf16, #tpu.memory_space<vmem>>, %arg3: memref<1x128xf32, #tpu.memory_space<vmem>>, %arg4: memref<1x128xf32, #tpu.memory_space<vmem>>, %arg5: memref<2x128xf32, #tpu.memory_space<vmem>>) attributes {dimension_semantics = [#tpu.dimension_semantics<parallel>, #tpu.dimension_semantics<arbitrary>], iteration_bounds = array<i64: 1, 2>, scalar_prefetch = 0 : i64, scratch_operands = 0 : i64, tpu.core_type = #tpu.core_type<tc>, window_params = [{transform_indices = @transform_0, window_bounds = array<i64: 2, 32, 128>}, {pipeline_mode = #tpu.pipeline_mode<synchronous>, transform_indices = @transform_1, window_bounds = array<i64: 1, 128>}, {pipeline_mode = #tpu.pipeline_mode<synchronous>, transform_indices = @transform_2, window_bounds = array<i64: 1, 128>}, {transform_indices = @transform_3, window_bounds = array<i64: 2, 128>}]} {
    %c0 = arith.constant 0 : index
    %c0_0 = arith.constant 0 : index
    %c0_1 = arith.constant 0 : index
    %0 = vector.load %arg2[%c0, %c0_0, %c0_1] : memref<2x32x128xbf16, #tpu.memory_space<vmem>>, vector<2x32x128xbf16>
    %1 = arith.extf %0 : vector<2x32x128xbf16> to vector<2x32x128xf32>
    %c0_2 = arith.constant 0 : index
    %c0_3 = arith.constant 0 : index
    %2 = vector.load %arg3[%c0_2, %c0_3] : memref<1x128xf32, #tpu.memory_space<vmem>>, vector<1x128xf32>
    %3 = vector.shape_cast %2 : vector<1x128xf32> to vector<1x1x128xf32>
    %4 = vector.broadcast %3 : vector<1x1x128xf32> to vector<2x32x128xf32>
    %5 = arith.mulf %1, %4 : vector<2x32x128xf32>
    %c0_4 = arith.constant 0 : index
    %c0_5 = arith.constant 0 : index
    %6 = vector.load %arg4[%c0_4, %c0_5] : memref<1x128xf32, #tpu.memory_space<vmem>>, vector<1x128xf32>
    %7 = vector.shape_cast %6 : vector<1x128xf32> to vector<1x1x128xf32>
    %8 = vector.broadcast %7 : vector<1x1x128xf32> to vector<2x32x128xf32>
    %9 = arith.addf %5, %8 : vector<2x32x128xf32>
    %cst = arith.constant 0.000000e+00 : f32
    %10 = vector.broadcast %cst : f32 to vector<2x32x128xf32>
    %11 = arith.maximumf %9, %10 : vector<2x32x128xf32>
    %cst_6 = arith.constant dense<0.000000e+00> : vector<2x128xf32>
    %12 = vector.multi_reduction <add>, %11, %cst_6 [1] : vector<2x32x128xf32> to vector<2x128xf32>
    %c0_i32 = arith.constant 0 : i32
    %13 = arith.cmpi eq, %arg1, %c0_i32 : i32
    %14 = arith.extui %13 : i1 to i32
    %c0_i32_7 = arith.constant 0 : i32
    %15 = arith.cmpi ne, %14, %c0_i32_7 : i32
    scf.if %15 {
      %cst_12 = arith.constant 0.000000e+00 : f32
      %19 = vector.broadcast %cst_12 : f32 to vector<2x128xf32>
      %c0_13 = arith.constant 0 : index
      %c0_14 = arith.constant 0 : index
      %20 = vector.load %arg5[%c0_13, %c0_14] : memref<2x128xf32, #tpu.memory_space<vmem>>, vector<2x128xf32>
      tpu.vector_store %arg5[%c0_13, %c0_14], %19 {strides = array<i32>} : memref<2x128xf32, #tpu.memory_space<vmem>>, vector<2x128xf32>,
    } else {
    }
    %c0_8 = arith.constant 0 : index
    %c0_9 = arith.constant 0 : index
    %16 = vector.load %arg5[%c0_8, %c0_9] : memref<2x128xf32, #tpu.memory_space<vmem>>, vector<2x128xf32>
    %17 = arith.addf %16, %12 : vector<2x128xf32>
    %c0_10 = arith.constant 0 : index
    %c0_11 = arith.constant 0 : index
    %18 = vector.load %arg5[%c0_10, %c0_11] : memref<2x128xf32, #tpu.memory_space<vmem>>, vector<2x128xf32>
    tpu.vector_store %arg5[%c0_10, %c0_11], %17 {strides = array<i32>} : memref<2x128xf32, #tpu.memory_space<vmem>>, vector<2x128xf32>,
    return
  }
  func.func @transform_0(%arg0: i32, %arg1: i32) -> (i32, i32, i32) {
    %c0_i32 = arith.constant 0 : i32
    %c0_i32_0 = arith.constant 0 : i32
    return %arg0, %arg1, %c0_i32 : i32, i32, i32
  }
  func.func @transform_1(%arg0: i32, %arg1: i32) -> (i32, i32) {
    %c0_i32 = arith.constant 0 : i32
    %c0_i32_0 = arith.constant 0 : i32
    %c0_i32_1 = arith.constant 0 : i32
    return %c0_i32, %c0_i32_0 : i32, i32
  }
  func.func @transform_2(%arg0: i32, %arg1: i32) -> (i32, i32) {
    %c0_i32 = arith.constant 0 : i32
    %c0_i32_0 = arith.constant 0 : i32
    %c0_i32_1 = arith.constant 0 : i32
    return %c0_i32, %c0_i32_0 : i32, i32
  }
  func.func @transform_3(%arg0: i32, %arg1: i32) -> (i32, i32) {
    %c0_i32 = arith.constant 0 : i32
    %c0_i32_0 = arith.constant 0 : i32
    return %arg0, %c0_i32 : i32, i32
  }
}

module attributes {stable_mosaic.version = 11 : i64} {
  func.func @_mlp_head_kernel(%arg0: i32, %arg1: memref<2x128xf32, #tpu.memory_space<vmem>>, %arg2: memref<128x128xf32, #tpu.memory_space<vmem>>, %arg3: memref<1x128xf32, #tpu.memory_space<vmem>>, %arg4: memref<1x128xf32, #tpu.memory_space<vmem>>, %arg5: memref<1x128xf32, #tpu.memory_space<vmem>>, %arg6: memref<128x128xf32, #tpu.memory_space<vmem>>, %arg7: memref<1x128xf32, #tpu.memory_space<vmem>>, %arg8: memref<2x128xf32, #tpu.memory_space<vmem>>) attributes {dimension_semantics = [#tpu.dimension_semantics<arbitrary>], iteration_bounds = array<i64: 1>, scalar_prefetch = 0 : i64, scratch_operands = 0 : i64, tpu.core_type = #tpu.core_type<tc>, window_params = [{pipeline_mode = #tpu.pipeline_mode<synchronous>, transform_indices = @transform_0, window_bounds = array<i64: 2, 128>}, {pipeline_mode = #tpu.pipeline_mode<synchronous>, transform_indices = @transform_1, window_bounds = array<i64: 128, 128>}, {pipeline_mode = #tpu.pipeline_mode<synchronous>, transform_indices = @transform_2, window_bounds = array<i64: 1, 128>}, {pipeline_mode = #tpu.pipeline_mode<synchronous>, transform_indices = @transform_3, window_bounds = array<i64: 1, 128>}, {pipeline_mode = #tpu.pipeline_mode<synchronous>, transform_indices = @transform_4, window_bounds = array<i64: 1, 128>}, {pipeline_mode = #tpu.pipeline_mode<synchronous>, transform_indices = @transform_5, window_bounds = array<i64: 128, 128>}, {pipeline_mode = #tpu.pipeline_mode<synchronous>, transform_indices = @transform_6, window_bounds = array<i64: 1, 128>}, {pipeline_mode = #tpu.pipeline_mode<synchronous>, transform_indices = @transform_7, window_bounds = array<i64: 2, 128>}]} {
    %c0 = arith.constant 0 : index
    %c0_0 = arith.constant 0 : index
    %0 = vector.load %arg1[%c0, %c0_0] : memref<2x128xf32, #tpu.memory_space<vmem>>, vector<2x128xf32>
    %c0_1 = arith.constant 0 : index
    %c0_2 = arith.constant 0 : index
    %1 = vector.load %arg2[%c0_1, %c0_2] : memref<128x128xf32, #tpu.memory_space<vmem>>, vector<128x128xf32>
    %cst = arith.constant dense<0.000000e+00> : vector<2x128xf32>
    %2 = tpu.matmul %0, %1, %cst {dimension_numbers = #tpu.dot_dimension_numbers<[1], [0], [0], [1], [0, 0, 1, 1], [], []>} : vector<2x128xf32>, vector<128x128xf32>, vector<2x128xf32> -> vector<2x128xf32>
    %c0_3 = arith.constant 0 : index
    %c0_4 = arith.constant 0 : index
    %3 = vector.load %arg3[%c0_3, %c0_4] : memref<1x128xf32, #tpu.memory_space<vmem>>, vector<1x128xf32>
    %4 = vector.broadcast %3 : vector<1x128xf32> to vector<2x128xf32>
    %5 = arith.addf %2, %4 : vector<2x128xf32>
    %cst_5 = arith.constant 0.000000e+00 : f32
    %6 = vector.broadcast %cst_5 : f32 to vector<2x128xf32>
    %7 = arith.maximumf %5, %6 : vector<2x128xf32>
    %cst_6 = arith.constant dense<0.000000e+00> : vector<128xf32>
    %8 = vector.multi_reduction <add>, %7, %cst_6 [0] : vector<2x128xf32> to vector<128xf32>
    %9 = vector.shape_cast %8 : vector<128xf32> to vector<1x128xf32>
    %cst_7 = arith.constant 2.000000e+00 : f32
    %10 = vector.broadcast %cst_7 : f32 to vector<1x128xf32>
    %11 = arith.divf %9, %10 : vector<1x128xf32>
    %12 = arith.mulf %7, %7 : vector<2x128xf32>
    %cst_8 = arith.constant dense<0.000000e+00> : vector<128xf32>
    %13 = vector.multi_reduction <add>, %12, %cst_8 [0] : vector<2x128xf32> to vector<128xf32>
    %14 = vector.shape_cast %13 : vector<128xf32> to vector<1x128xf32>
    %cst_9 = arith.constant 2.000000e+00 : f32
    %15 = vector.broadcast %cst_9 : f32 to vector<1x128xf32>
    %16 = arith.divf %14, %15 : vector<1x128xf32>
    %17 = arith.mulf %11, %11 : vector<1x128xf32>
    %18 = arith.subf %16, %17 : vector<1x128xf32>
    %19 = vector.broadcast %11 : vector<1x128xf32> to vector<2x128xf32>
    %20 = arith.subf %7, %19 : vector<2x128xf32>
    %cst_10 = arith.constant 9.99999974E-6 : f32
    %21 = vector.broadcast %cst_10 : f32 to vector<1x128xf32>
    %22 = arith.addf %18, %21 : vector<1x128xf32>
    %23 = math.rsqrt %22 : vector<1x128xf32>
    %24 = vector.broadcast %23 : vector<1x128xf32> to vector<2x128xf32>
    %25 = arith.mulf %20, %24 : vector<2x128xf32>
    %c0_11 = arith.constant 0 : index
    %c0_12 = arith.constant 0 : index
    %26 = vector.load %arg4[%c0_11, %c0_12] : memref<1x128xf32, #tpu.memory_space<vmem>>, vector<1x128xf32>
    %27 = vector.broadcast %26 : vector<1x128xf32> to vector<2x128xf32>
    %28 = arith.mulf %25, %27 : vector<2x128xf32>
    %c0_13 = arith.constant 0 : index
    %c0_14 = arith.constant 0 : index
    %29 = vector.load %arg5[%c0_13, %c0_14] : memref<1x128xf32, #tpu.memory_space<vmem>>, vector<1x128xf32>
    %30 = vector.broadcast %29 : vector<1x128xf32> to vector<2x128xf32>
    %31 = arith.addf %28, %30 : vector<2x128xf32>
    %c0_15 = arith.constant 0 : index
    %c0_16 = arith.constant 0 : index
    %32 = vector.load %arg6[%c0_15, %c0_16] : memref<128x128xf32, #tpu.memory_space<vmem>>, vector<128x128xf32>
    %cst_17 = arith.constant dense<0.000000e+00> : vector<2x128xf32>
    %33 = tpu.matmul %31, %32, %cst_17 {dimension_numbers = #tpu.dot_dimension_numbers<[1], [0], [0], [1], [0, 0, 1, 1], [], []>} : vector<2x128xf32>, vector<128x128xf32>, vector<2x128xf32> -> vector<2x128xf32>
    %c0_18 = arith.constant 0 : index
    %c0_19 = arith.constant 0 : index
    %34 = vector.load %arg7[%c0_18, %c0_19] : memref<1x128xf32, #tpu.memory_space<vmem>>, vector<1x128xf32>
    %35 = vector.broadcast %34 : vector<1x128xf32> to vector<2x128xf32>
    %36 = arith.addf %33, %35 : vector<2x128xf32>
    %cst_20 = arith.constant dense<0.000000e+00> : vector<128xf32>
    %37 = vector.multi_reduction <add>, %36, %cst_20 [0] : vector<2x128xf32> to vector<128xf32>
    %38 = vector.shape_cast %37 : vector<128xf32> to vector<1x128xf32>
    %cst_21 = arith.constant 2.000000e+00 : f32
    %39 = vector.broadcast %cst_21 : f32 to vector<1x128xf32>
    %40 = arith.divf %38, %39 : vector<1x128xf32>
    %41 = arith.mulf %36, %36 : vector<2x128xf32>
    %cst_22 = arith.constant dense<0.000000e+00> : vector<128xf32>
    %42 = vector.multi_reduction <add>, %41, %cst_22 [0] : vector<2x128xf32> to vector<128xf32>
    %43 = vector.shape_cast %42 : vector<128xf32> to vector<1x128xf32>
    %cst_23 = arith.constant 2.000000e+00 : f32
    %44 = vector.broadcast %cst_23 : f32 to vector<1x128xf32>
    %45 = arith.divf %43, %44 : vector<1x128xf32>
    %46 = arith.mulf %40, %40 : vector<1x128xf32>
    %47 = arith.subf %45, %46 : vector<1x128xf32>
    %48 = vector.broadcast %40 : vector<1x128xf32> to vector<2x128xf32>
    %49 = arith.subf %36, %48 : vector<2x128xf32>
    %cst_24 = arith.constant 9.99999974E-6 : f32
    %50 = vector.broadcast %cst_24 : f32 to vector<1x128xf32>
    %51 = arith.addf %47, %50 : vector<1x128xf32>
    %52 = math.rsqrt %51 : vector<1x128xf32>
    %53 = vector.broadcast %52 : vector<1x128xf32> to vector<2x128xf32>
    %54 = arith.mulf %49, %53 : vector<2x128xf32>
    %c0_25 = arith.constant 0 : index
    %c0_26 = arith.constant 0 : index
    %55 = vector.load %arg8[%c0_25, %c0_26] : memref<2x128xf32, #tpu.memory_space<vmem>>, vector<2x128xf32>
    tpu.vector_store %arg8[%c0_25, %c0_26], %54 {strides = array<i32>} : memref<2x128xf32, #tpu.memory_space<vmem>>, vector<2x128xf32>,
    return
  }
  func.func @transform_0(%arg0: i32) -> (i32, i32) {
    %c0_i32 = arith.constant 0 : i32
    %c0_i32_0 = arith.constant 0 : i32
    %c0_i32_1 = arith.constant 0 : i32
    return %c0_i32, %c0_i32_0 : i32, i32
  }
  func.func @transform_1(%arg0: i32) -> (i32, i32) {
    %c0_i32 = arith.constant 0 : i32
    %c0_i32_0 = arith.constant 0 : i32
    %c0_i32_1 = arith.constant 0 : i32
    return %c0_i32, %c0_i32_0 : i32, i32
  }
  func.func @transform_2(%arg0: i32) -> (i32, i32) {
    %c0_i32 = arith.constant 0 : i32
    %c0_i32_0 = arith.constant 0 : i32
    %c0_i32_1 = arith.constant 0 : i32
    return %c0_i32, %c0_i32_0 : i32, i32
  }
  func.func @transform_3(%arg0: i32) -> (i32, i32) {
    %c0_i32 = arith.constant 0 : i32
    %c0_i32_0 = arith.constant 0 : i32
    %c0_i32_1 = arith.constant 0 : i32
    return %c0_i32, %c0_i32_0 : i32, i32
  }
  func.func @transform_4(%arg0: i32) -> (i32, i32) {
    %c0_i32 = arith.constant 0 : i32
    %c0_i32_0 = arith.constant 0 : i32
    %c0_i32_1 = arith.constant 0 : i32
    return %c0_i32, %c0_i32_0 : i32, i32
  }
  func.func @transform_5(%arg0: i32) -> (i32, i32) {
    %c0_i32 = arith.constant 0 : i32
    %c0_i32_0 = arith.constant 0 : i32
    %c0_i32_1 = arith.constant 0 : i32
    return %c0_i32, %c0_i32_0 : i32, i32
  }
  func.func @transform_6(%arg0: i32) -> (i32, i32) {
    %c0_i32 = arith.constant 0 : i32
    %c0_i32_0 = arith.constant 0 : i32
    %c0_i32_1 = arith.constant 0 : i32
    return %c0_i32, %c0_i32_0 : i32, i32
  }
  func.func @transform_7(%arg0: i32) -> (i32, i32) {
    %c0_i32 = arith.constant 0 : i32
    %c0_i32_0 = arith.constant 0 : i32
    %c0_i32_1 = arith.constant 0 : i32
    return %c0_i32, %c0_i32_0 : i32, i32
  }
}

</mosaic_0001>

<bundles_post_ra>
// kernel: projection_resfc_forward.3
= control target key start
LH: loop header
LB: loop body
LE: loop exit
PB: predicated region body
PF: predicated region fallthrough
CT: control target
= control target key end

     0   :  { %s817_s15 = smov 0   ;;  %s819_s16 = smov 0   ;;  %s870_s0 = inlined_call_operand.vmem [shape: bf16[128,36], index: 0, kind: input, shape index: {}]   ;;  %s871_s1 = inlined_call_operand.vmem [shape: bf16[36,128], index: 1, kind: input, shape index: {}]   ;;  %s872_s2 = inlined_call_operand.vmem [shape: bf16[128,128], index: 2, kind: output, shape index: {0}]   ;;  %s873_s3 = inlined_call_operand.vmem [shape: f32[2,1,128], index: 3, kind: output, shape index: {1}]   ;;  %s874_s4 = inlined_call_operand.vmem [shape: f32[2,1,128], index: 4, kind: output, shape index: {2}]  }
   0x1   :  { %s821_s17 = smov 0  }
   0x2 LB: > { %s24_s18 = sadd.s32 1, %s786_s16  ;;  %p651_p0 = scmp.ge.s32.totalorder %s790_s17, 1  ;;  %s790_s17 = sphi %s821_s17, %s15_s17   ;;  %s786_s16 = sphi %s819_s16, %s876_s16   ;;  %s782_s15 = sphi %s817_s15, %s875_s15  }
   0x3   : > { %p25_p1 = scmp.ge.s32.totalorder %s24_s18, 2  ;;  %p195_p2 = scmp.lt.s32.totalorder %s790_s17, 3 }
   0x5   : > { %s878_s18 = smov (%p25_p1, %s24_s18), 0  ;;  %p196_p3 = pnand %p651_p0, %p195_p2 }
   0x6   : > { %v761_v0 = vld [vmem:[%s871_s1] sm:$0xff] (!%p196_p3)   ;;  %v762_v1 = vld [vmem:[%s871_s1 + $0x8] sm:$0xff] (!%p196_p3)   ;;  %s652_s23 = sshll.u32 (!%p196_p3), %s782_s15, 3  ;;  %v763_v2 = vld [vmem:[%s871_s1 + $0x10] ss:$0 sps:$4 sm:$0x33] (!%p196_p3)  }
   0x7   : > { %199 = sbr.rel (%p196_p3) target bundleno = 267 (0x10b), region = 28  ;;  %715 = vmatprep.subr.bf16.mxu0 (!%p196_p3), %v761_v0  ;;  %729 = vmatprep.subr.bf16.mxu1 (!%p196_p3), %v761_v0  ;;  %p241_p4 = scmp.lt.s32.totalorder (!%p196_p3), %s652_s23, 15  ;;  %vm333_vm0 = vcmask (!%p196_p3), 1041408   ;;  %vm320_vm1 = vcmask (!%p196_p3), 293888  }
   0x8   : > { %716 = vmatpush3.bf16.msra.mxu0 (!%p196_p3), %v761_v0  ;;  %732 = vmatpush3.bf16.msra.mxu1 (!%p196_p3), %v761_v0  ;;  %v335_v3 = vsel (!%p196_p3), %vm333_vm0, %v763_v2, 0  ;;  %p259_p5 = scmp.lt.s32.totalorder (!%p196_p3), %s782_s15, 1 }
   0x9   : > { %717 = vmatprep.subr.bf16.mxu0 (!%p196_p3), %v762_v1  ;;  %730 = vmatprep.subr.bf16.mxu1 (!%p196_p3), %v762_v1 }
   0xc   : > { %718 = vmatpush3.bf16.msra.mxu0 (!%p196_p3), %v762_v1  ;;  %733 = vmatpush3.bf16.msra.mxu1 (!%p196_p3), %v762_v1 }
   0xd   : > { %735 = vmatprep.subr.msk.bf16.mxu0 (!%p196_p3), %vm333_vm0, %v763_v2  ;;  %736 = vmatprep.subr.msk.bf16.mxu1 (!%p196_p3), %vm333_vm0, %v763_v2 }
   0xe   : > { %s880_s23 = smov (!%p241_p4, %s652_s23), 15  ;;  %s882_s15 = smov (!%p259_p5, %s782_s15), 1 }
   0xf   : > { %s653_s26 = sshll.u32 %s880_s23, 2  ;;  %s264_s9 = scalar_lea.vmem %s873_s3, %s882_s15 }
  0x10   : > { %s244_s29 = scalar_lea.vmem %s870_s0, %s653_s26  ;;  %720 = vmatpush3.bf16.msra.mxu0 %v335_v3  ;;  %734 = vmatpush3.bf16.msra.mxu1 %v335_v3  ;;  %s257_s6 = scalar_lea.vmem %s872_s2, %s653_s26 }
  0x11   : > { %v764_v4 = vld [vmem:[%s244_s29] sm:$0xff]   ;;  %v765_v5 = vld [vmem:[%s244_s29 + $0x8] sm:$0xff]   ;;  %v766_v6 = vld [vmem:[%s244_s29 + $0x10] sm:$0xff]   ;;  %s270_s12 = scalar_lea.vmem %s874_s4, %s882_s15 }
  0x12   : > { %721 = vmatprep.mubr.msk.bf16.mxu0 %vm320_vm1, %v764_v4  ;;  %v767_v7 = vld [vmem:[%s244_s29 + $0x18] sm:$0xff]   ;;  %725 = vmatprep.mubr.msk.bf16.mxu1 %vm320_vm1, %v766_v6 }
  0x13   : > { %722 = vmatmul.mubr.msk.bf16.vlgmr.msra.gmra.mrb[0].mxu0 %vm320_vm1, %v765_v5  ;;  %726 = vmatmul.mubr.msk.bf16.vlgmr.msra.gmra.mrb[0].mxu1 %vm320_vm1, %v767_v7 }
  0xe6   : > { %v723_v8 = vpop.f32.mrb[0].mxu0  ;;  %v727_v9 = vpop.f32.mrb[0].mxu1 }
  0xe7   : > { %v371_v10 = vpop.f32.mrb[1].mxu0  ;;  %v387_v11 = vpop.f32.mrb[1].mxu1 }
  0xe8   : > { %v724_v12 = vpop.f32.mrb[2].mxu0  ;;  %v728_v13 = vpop.f32.mrb[2].mxu1 }
  0xe9   : > { %v403_v14 = vpack.c.bf16 %v724_v12, %v723_v8  ;;  %v374_v15 = vpop.f32.mrb[3].mxu0  ;;  %v405_v16 = vpack.c.bf16 %v728_v13, %v727_v9  ;;  %v390_v17 = vpop.f32.mrb[3].mxu1 }
  0xea   : > { %v402_v18 = vpack.c.bf16 %v374_v15, %v371_v10  ;;  %v404_v19 = vpack.c.bf16 %v390_v17, %v387_v11 }
  0xeb   : > { %705 = vst [vmem:[%s257_s6 + $0x8] sm:$0xff] %v403_v14   ;;  %707 = vst [vmem:[%s257_s6 + $0x18] sm:$0xff] %v405_v16   ;;  %v444_v20 = vunpack.c.l.bf16 %v403_v14  ;;  %v445_v23 = vunpack.c.h.bf16 %v403_v14  ;;  %v448_v35 = vunpack.c.l.bf16 %v405_v16  ;;  %v449_v39 = vunpack.c.h.bf16 %v405_v16 }
  0xec   : > { %689 = vst [vmem:[%s257_s6] sm:$0xff] %v402_v18   ;;  %v442_v21 = vunpack.c.l.bf16 %v402_v18  ;;  %v443_v22 = vunpack.c.h.bf16 %v402_v18  ;;  %706 = vst [vmem:[%s257_s6 + $0x10] sm:$0xff] %v404_v19   ;;  %v446_v30 = vunpack.c.l.bf16 %v404_v19  ;;  %v447_v33 = vunpack.c.h.bf16 %v404_v19 }
  0xed   : > { %v466_v27 = vmul.f32 %v444_v20, %v444_v20  ;;  %v467_v31 = vmul.f32 %v445_v23, %v445_v23  ;;  %v470_v43 = vmul.f32 %v448_v35, %v448_v35  ;;  %v471_v46 = vmul.f32 %v449_v39, %v449_v39 }
  0xee   : > { %v450_v24 = vadd.f32 %v443_v22, %v442_v21  ;;  %v464_v25 = vmul.f32 %v442_v21, %v442_v21  ;;  %v465_v26 = vmul.f32 %v443_v22, %v443_v22  ;;  %v468_v37 = vmul.f32 %v446_v30, %v446_v30 }
  0xef   : > { %v469_v41 = vmul.f32 %v447_v33, %v447_v33 }
  0xf0   : > { %v451_v28 = vadd.f32 %v450_v24, %v444_v20  ;;  %v472_v29 = vadd.f32 %v465_v26, %v464_v25 }
  0xf2   : > { %v473_v32 = vadd.f32 %v472_v29, %v466_v27  ;;  %v452_v34 = vadd.f32 %v451_v28, %v445_v23 }
  0xf4   : > { %v453_v36 = vadd.f32 %v452_v34, %v446_v30  ;;  %v474_v38 = vadd.f32 %v473_v32, %v467_v31 }
  0xf6   : > { %v454_v40 = vadd.f32 %v453_v36, %v447_v33  ;;  %v475_v42 = vadd.f32 %v474_v38, %v468_v37 }
  0xf8   : > { %v455_v44 = vadd.f32 %v454_v40, %v448_v35  ;;  %v476_v45 = vadd.f32 %v475_v42, %v469_v41 }
  0xfa   : > { %v456_v47 = vadd.f32 %v455_v44, %v449_v39  ;;  %v477_v48 = vadd.f32 %v476_v45, %v470_v43 }
  0xfc   : > { %v457_v49 = vrot.slane %v456_v47, 4  ;;  %v478_v50 = vadd.f32 %v477_v48, %v471_v46 }
  0xfe   : > { %v458_v51 = vadd.f32 %v457_v49, %v456_v47  ;;  %v479_v52 = vrot.slane %v478_v50, 4 }
 0x100   : > { %v459_v53 = vrot.slane %v458_v51, 2  ;;  %v480_v54 = vadd.f32 %v479_v52, %v478_v50 }
 0x102   : > { %v460_v55 = vadd.f32 %v459_v53, %v458_v51  ;;  %v481_v56 = vrot.slane %v480_v54, 2 }
 0x104   : > { %v461_v57 = vrot.slane %v460_v55, 1  ;;  %v482_v58 = vadd.f32 %v481_v56, %v480_v54 }
 0x106   : > { %v462_v59 = vadd.f32 %v461_v57, %v460_v55  ;;  %v483_v60 = vrot.slane %v482_v58, 1 }
 0x108   : > { %463 = vst [vmem:[%s264_s9] sm:$0x1] %v462_v59  ;;  %v484_v61 = vadd.f32 %v483_v60, %v482_v58 }
 0x10a   : > { %485 = vst [vmem:[%s270_s12] sm:$0x1] %v484_v61 }
 0x10b PF: > { %s15_s17 = sadd.s32 1, %s790_s17   ;;  %s875_s15 = smov %s786_s16 }
 0x10c   : > { %p12_p6 = scmp.ge.s32.totalorder %s15_s17, 4   ;;  %s876_s16 = smov %s878_s18 }
 0x10e   :  { %14 = sbr.rel (!%p12_p6) target bundleno = 2 (0x2), region = 85 }

// kernel: projection_resfc_forward.4
= control target key start
LH: loop header
LB: loop body
LE: loop exit
PB: predicated region body
PF: predicated region fallthrough
CT: control target
= control target key end

     0   :  { %s547_s12 = smov 0   ;;  %s549_s13 = smov 0   ;;  %s624_s0 = inlined_call_operand.vmem [shape: bf16[2,64,128], index: 0, kind: input, shape index: {}]   ;;  %s625_s1 = inlined_call_operand.vmem [shape: f32[1,128], index: 1, kind: input, shape index: {}]   ;;  %s626_s2 = inlined_call_operand.vmem [shape: f32[1,128], index: 2, kind: input, shape index: {}]   ;;  %s627_s3 = inlined_call_operand.vmem [shape: f32[2,128], index: 3, kind: output, shape index: {}]  }
   0x1   :  { %s551_s14 = smov 0   ;;  %s553_s15 = smov 0  }
   0x2   :  { %s555_s16 = smov 0  }
   0x3 LB: > { %s22_s17 = sadd.s32 1, %s520_s15  ;;  %p41_p1 = scmp.ne.s32.totalorder %s512_s13, %s508_s12  ;;  %s524_s16 = sphi %s555_s16, %s13_s16   ;;  %s520_s15 = sphi %s553_s15, %s631_s15   ;;  %s516_s14 = sphi %s551_s14, %s630_s14   ;;  %s512_s13 = sphi %s549_s13, %s629_s13   ;;  %s508_s12 = sphi %s547_s12, %s628_s12  }
   0x4   : > { %p23_p0 = scmp.ge.s32.totalorder %s22_s17, 2  ;;  %p42_p2 = scmp.eq.s32.totalorder %s524_s16, 0 }
   0x5   : > { %s34_s19 = sadd.s32 1, %s512_s13  ;;  %p413_p5 = scmp.ge.s32.totalorder %s524_s16, 2 }
   0x6   : > { %s633_s17 = smov (%p23_p0, %s22_s17), 0  ;;  %p43_p3 = por %p42_p2, %p41_p1 }
   0x7   : > { %s30_s18 = ssub.s32 %s520_s15, %s633_s17  ;;  %141 = sbr.rel (%p413_p5) target bundleno = 21 (0x15), region = 24 }
   0x8   : > { %p32_p4 = scmp.eq.s32.totalorder %s30_s18, 0 }
   0xa   : > { %s582_s20 = scalar_select %p32_p4, %s512_s13, %s34_s19  }
   0xe   : > { %144 = sbr.rel (!%p43_p3) target bundleno = 21 (0x15), region = 28  ;;  %s146_s21 = sand.u32 (%p43_p3), 1, %s512_s13  }
   0xf   : > { %s425_s22 = sshll.u32 (%p43_p3), %s520_s15, 4  ;;  %s414_s23 = sshll.u32 (%p43_p3), %s146_s21, 5 }
  0x10   : > { %s154_s26 = scalar_lea.vmem (%p43_p3), %s624_s0, %s425_s22  ;;  %s148_s27 = scalar_lea.vmem (%p43_p3), [#allocation2], %s414_s23 }
  0x11   : > { %v170_v0 = vld [vmem:[%s154_s26] sm:$0xff] (%p43_p3)   ;;  %v174_v1 = vld [vmem:[%s154_s26 + $0x8] sm:$0xff] (%p43_p3)  }
  0x12   : > { %v178_v2 = vld [vmem:[%s154_s26 + $0x20] sm:$0xff] (%p43_p3)   ;;  %171 = vst [vmem:[%s148_s27] sm:$0xff] (%p43_p3), %v170_v0   ;;  %175 = vst [vmem:[%s148_s27 + $0x8] sm:$0xff] (%p43_p3), %v174_v1   ;;  %v182_v3 = vld [vmem:[%s154_s26 + $0x28] sm:$0xff] (%p43_p3)  }
  0x13   : > { %179 = vst [vmem:[%s148_s27 + $0x10] sm:$0xff] (%p43_p3), %v178_v2   ;;  %183 = vst [vmem:[%s148_s27 + $0x18] sm:$0xff] (%p43_p3), %v182_v3  }
  0x15 PF: > { %p417_p6 = scmp.ge.s32.totalorder %s524_s16, 1  ;;  %p223_p7 = scmp.lt.s32.totalorder %s524_s16, 3 }
  0x17   : > { %p224_p8 = pnand %p417_p6, %p223_p7 }
  0x18   : > { %s230_s28 = sand.u32 (!%p224_p8), 1, %s508_s12   ;;  %v419_v4 = vld [vmem:[%s625_s1] ss:$0 sm:$0xff] (!%p224_p8)  ;;  %p421_p9 = scmp.ne.s32.totalorder (!%p224_p8), %s516_s14, 0 }
  0x19   : > { %227 = sbr.rel (%p224_p8) target bundleno = 59 (0x3b), region = 69  ;;  %s418_s29 = sshll.u32 (!%p224_p8), %s230_s28, 5  ;;  %v420_v17 = vld [vmem:[%s626_s2] ss:$0 sm:$0xff] (!%p224_p8) }
  0x1a   : > { %s232_s5 = scalar_lea.vmem (!%p224_p8), [#allocation2], %s418_s29 }
  0x1b   : > { %v427_v5 = vld [vmem:[%s232_s5] sm:$0xff] (!%p224_p8)   ;;  %v442_v6 = vld [vmem:[%s232_s5 + $0x8] sm:$0xff] (!%p224_p8)   ;;  %v443_v7 = vld [vmem:[%s232_s5 + $0x10] sm:$0xff] (!%p224_p8)  }
  0x1c   : > { %v428_v8 = vunpack.c.l.bf16 (!%p224_p8), %v427_v5  ;;  %v429_v9 = vunpack.c.h.bf16 (!%p224_p8), %v427_v5  ;;  %v432_v10 = vunpack.c.l.bf16 (!%p224_p8), %v442_v6  ;;  %v433_v11 = vunpack.c.h.bf16 (!%p224_p8), %v442_v6  ;;  %v444_v12 = vld [vmem:[%s232_s5 + $0x18] sm:$0xff] (!%p224_p8)  }
  0x1d   : > { %v436_v13 = vunpack.c.l.bf16 (!%p224_p8), %v443_v7  ;;  %v437_v14 = vunpack.c.h.bf16 (!%p224_p8), %v443_v7  ;;  %v440_v15 = vunpack.c.l.bf16 (!%p224_p8), %v444_v12  ;;  %v441_v16 = vunpack.c.h.bf16 (!%p224_p8), %v444_v12 }
  0x1e   : > { %v281_v18 = vmul.f32 (!%p224_p8), %v428_v8, %v419_v4  ;;  %v282_v19 = vmul.f32 (!%p224_p8), %v429_v9, %v419_v4  ;;  %v283_v20 = vmul.f32 (!%p224_p8), %v432_v10, %v419_v4  ;;  %v284_v21 = vmul.f32 (!%p224_p8), %v433_v11, %v419_v4 }
  0x1f   : > { %v285_v22 = vmul.f32 (!%p224_p8), %v436_v13, %v419_v4  ;;  %v286_v23 = vmul.f32 (!%p224_p8), %v437_v14, %v419_v4  ;;  %v287_v24 = vmul.f32 (!%p224_p8), %v440_v15, %v419_v4  ;;  %v288_v25 = vmul.f32 (!%p224_p8), %v441_v16, %v419_v4 }
  0x20   : > { %v296_v26 = vadd.f32 %v420_v17, %v281_v18  ;;  %v297_v27 = vadd.f32 %v420_v17, %v282_v19  ;;  %v298_v28 = vadd.f32 %v420_v17, %v283_v20  ;;  %v299_v29 = vadd.f32 %v420_v17, %v284_v21 }
  0x21   : > { %v300_v30 = vadd.f32 %v420_v17, %v285_v22  ;;  %v301_v31 = vadd.f32 %v420_v17, %v286_v23  ;;  %v302_v32 = vadd.f32 %v420_v17, %v287_v24  ;;  %v303_v33 = vadd.f32 %v420_v17, %v288_v25 }
  0x22   : > { %v304_v34 = vmax.f32 %v296_v26, 0.0  ;;  %v305_v35 = vmax.f32 %v297_v27, 0.0  ;;  %v306_v36 = vmax.f32 %v298_v28, 0.0  ;;  %v307_v40 = vmax.f32 %v299_v29, 0.0 }
  0x23   : > { %v308_v37 = vmax.f32 %v300_v30, 0.0  ;;  %v309_v38 = vmax.f32 %v301_v31, 0.0  ;;  %v310_v39 = vmax.f32 %v302_v32, 0.0  ;;  %v311_v42 = vmax.f32 %v303_v33, 0.0 }
  0x24   : > { %v312_v41 = vadd.f32 %v305_v35, %v304_v34  ;;  %v526_v60 = vmov (!%p421_p9), 0.0  }
  0x25   : > { %v321_v43 = vadd.f32 %v309_v38, %v308_v37  ;;  %334 = vst [vmem:[%s627_s3] sm:$0x3] (!%p421_p9), %v526_v60 }
  0x26   : > { %v313_v44 = vadd.f32 %v312_v41, %v306_v36 }
  0x27   : > { %v322_v45 = vadd.f32 %v321_v43, %v310_v39 }
  0x28   : > { %v314_v46 = vadd.f32 %v313_v44, %v307_v40 }
  0x29   : > { %v323_v47 = vadd.f32 %v322_v45, %v311_v42 }
  0x2a   : > { %v315_v48 = vrot.slane %v314_v46, 4 }
  0x2b   : > { %v324_v49 = vrot.slane %v323_v47, 4 }
  0x2c   : > { %v316_v50 = vadd.f32 %v315_v48, %v314_v46 }
  0x2d   : > { %v325_v51 = vadd.f32 %v324_v49, %v323_v47 }
  0x2e   : > { %v317_v52 = vrot.slane %v316_v50, 2 }
  0x2f   : > { %v326_v53 = vrot.slane %v325_v51, 2  ;;  %333 = sbr.rel (%p421_p9) target bundleno = 54 (0x36), region = 77 }
  0x30   : > { %v318_v54 = vadd.f32 %v317_v52, %v316_v50 }
  0x31   : > { %v327_v55 = vadd.f32 %v326_v53, %v325_v51 }
  0x32   : > { %v319_v56 = vrot.slane %v318_v54, 1 }
  0x33   : > { %v328_v57 = vrot.slane %v327_v55, 1 }
  0x34   : > { %v320_v58 = vadd.f32 %v319_v56, %v318_v54 }
  0x35   : > { %v329_v59 = vadd.f32 %v328_v57, %v327_v55 }
  0x36 PF: > { %v335_v61 = vld [vmem:[%s627_s3] sm:$0x3]  ;;  %vm338_vm0 = vcmask 1041409  }
  0x37   : > { %v339_v62 = vsel %vm338_vm0, %v329_v59, %v320_v58 }
  0x38   : > { %v341_v63 = vadd.f32 %v339_v62, %v335_v61 }
  0x3a   : > { %342 = vst [vmem:[%s627_s3] sm:$0x3] %v341_v63 }
  0x3b PF: > { %s13_s16 = sadd.s32 1, %s524_s16   ;;  %s628_s12 = smov %s512_s13 }
  0x3c   : > { %p10_p10 = scmp.ge.s32.totalorder %s13_s16, 4   ;;  %s629_s13 = smov %s582_s20 }
  0x3d   : > { %s630_s14 = smov %s520_s15  ;;  %s631_s15 = smov %s633_s17 }
  0x3e   :  { %12 = sbr.rel (!%p10_p10) target bundleno = 3 (0x3), region = 112 }

// kernel: projection_resfc_forward.5
= control target key start
LH: loop header
LB: loop body
LE: loop exit
PB: predicated region body
PF: predicated region fallthrough
CT: control target
= control target key end

     0   :  { %v482_v3 = vmov 0.0|0.0   ;;  %vm483_vm0 = vmmov 0   ;;  %v484_v6 = vmov 0.0   ;;  %s669_s0 = inlined_call_operand.vmem [shape: f32[2,128], index: 0, kind: input, shape index: {}]   ;;  %s670_s1 = inlined_call_operand.vmem [shape: f32[128,128], index: 1, kind: input, shape index: {}]   ;;  %s671_s2 = inlined_call_operand.vmem [shape: f32[1,128], index: 2, kind: input, shape index: {}]   ;;  %s672_s3 = inlined_call_operand.vmem [shape: f32[1,128], index: 3, kind: input, shape index: {}]   ;;  %s673_s4 = inlined_call_operand.vmem [shape: f32[1,128], index: 4, kind: input, shape index: {}]   ;;  %s674_s5 = inlined_call_operand.vmem [shape: f32[128,128], index: 5, kind: input, shape index: {}]   ;;  %s675_s6 = inlined_call_operand.vmem [shape: f32[1,128], index: 6, kind: input, shape index: {}]   ;;  %s676_s7 = inlined_call_operand.hbm [shape: f32[2,128], index: 7, kind: output, shape index: {}]  }
   0x1   :  { %v28_v0 = vld [vmem:[%s670_s1] sm:$0xff]  ;;  %v29_v1 = vld [vmem:[%s670_s1 + $0x8] sm:$0xff]  ;;  %v30_v2 = vld [vmem:[%s670_s1 + $0x10] sm:$0xff]  ;;  %402 = vmatprep.subr.bf16.mxu0 %v482_v3  ;;  %364 = vmatprep.mubr.msk.f32.mxu0 %vm483_vm0, %v484_v6 }
   0x2   :  { %v403_v4 = vpack.c.bf16 %v29_v1, %v28_v0  ;;  %v31_v5 = vld [vmem:[%s670_s1 + $0x18] sm:$0xff]  ;;  %426 = vmatprep.subr.bf16.mxu1 %v482_v3  ;;  %399 = vmatprep.mubr.msk.f32.mxu1 %vm483_vm0, %v484_v6  ;;  %v32_v8 = vld [vmem:[%s670_s1 + $0x20] sm:$0xff]  ;;  %v33_v9 = vld [vmem:[%s670_s1 + $0x28] sm:$0xff] }
   0x3   :  { %v406_v7 = vpack.c.bf16 %v31_v5, %v30_v2 }
   0x4   :  { %404 = vmatpush3.bf16.msra.mxu0 %v403_v4 }
   0x5   :  { %405 = vmatprep.subr.bf16.mxu0 %v482_v3 }
   0x6   :  { %12 = vsyncpa [#allocation3], 0  ;;  %v409_v10 = vpack.c.bf16 %v33_v9, %v32_v8  ;;  %v34_v11 = vld [vmem:[%s670_s1 + $0x30] sm:$0xff]  ;;  %v35_v12 = vld [vmem:[%s670_s1 + $0x38] sm:$0xff]  ;;  %vm122_vm1 = vcmask 1041408  }
   0x7   :  { %v412_v13 = vpack.c.bf16 %v35_v12, %v34_v11  ;;  %v36_v14 = vld [vmem:[%s670_s1 + $0x40] sm:$0xff]  ;;  %v37_v15 = vld [vmem:[%s670_s1 + $0x48] sm:$0xff]  ;;  %v38_v17 = vld [vmem:[%s670_s1 + $0x50] sm:$0xff] }
   0x8   :  { %407 = vmatpush3.bf16.msra.mxu0 %v406_v7  ;;  %v415_v16 = vpack.c.bf16 %v37_v15, %v36_v14  ;;  %v39_v18 = vld [vmem:[%s670_s1 + $0x58] sm:$0xff]  ;;  %v40_v20 = vld [vmem:[%s670_s1 + $0x60] sm:$0xff]  ;;  %v41_v21 = vld [vmem:[%s670_s1 + $0x68] sm:$0xff] }
   0x9   :  { %408 = vmatprep.subr.bf16.mxu0 %v482_v3  ;;  %v418_v19 = vpack.c.bf16 %v39_v18, %v38_v17  ;;  %v421_v22 = vpack.c.bf16 %v41_v21, %v40_v20  ;;  %v42_v23 = vld [vmem:[%s670_s1 + $0x70] sm:$0xff]  ;;  %v43_v24 = vld [vmem:[%s670_s1 + $0x78] sm:$0xff]  ;;  %v27_v26 = vld [vmem:[%s669_s0] sm:$0x3] }
   0xa   :  { %v424_v25 = vpack.c.bf16 %v43_v24, %v42_v23  ;;  %v163_v27 = vld [vmem:[%s674_s5] sm:$0xff]  ;;  %v164_v28 = vld [vmem:[%s674_s5 + $0x8] sm:$0xff]  ;;  %v165_v30 = vld [vmem:[%s674_s5 + $0x10] sm:$0xff] }
   0xb   :  { %v427_v29 = vpack.c.bf16 %v164_v28, %v163_v27  ;;  %v166_v31 = vld [vmem:[%s674_s5 + $0x18] sm:$0xff]  ;;  %v167_v33 = vld [vmem:[%s674_s5 + $0x20] sm:$0xff]  ;;  %v168_v34 = vld [vmem:[%s674_s5 + $0x28] sm:$0xff] }
   0xc   :  { %410 = vmatpush3.bf16.msra.mxu0 %v409_v10  ;;  %v430_v32 = vpack.c.bf16 %v166_v31, %v165_v30  ;;  %v433_v35 = vpack.c.bf16 %v168_v34, %v167_v33  ;;  %v169_v36 = vld [vmem:[%s674_s5 + $0x30] sm:$0xff]  ;;  %v170_v37 = vld [vmem:[%s674_s5 + $0x38] sm:$0xff]  ;;  %v171_v39 = vld [vmem:[%s674_s5 + $0x40] sm:$0xff] }
   0xd   :  { %411 = vmatprep.subr.bf16.mxu0 %v482_v3  ;;  %428 = vmatpush3.bf16.msra.mxu1 %v427_v29  ;;  %v436_v38 = vpack.c.bf16 %v170_v37, %v169_v36  ;;  %v172_v40 = vld [vmem:[%s674_s5 + $0x48] sm:$0xff]  ;;  %v173_v42 = vld [vmem:[%s674_s5 + $0x50] sm:$0xff]  ;;  %v174_v43 = vld [vmem:[%s674_s5 + $0x58] sm:$0xff] }
   0xe   :  { %429 = vmatprep.subr.bf16.mxu1 %v482_v3  ;;  %v439_v41 = vpack.c.bf16 %v172_v40, %v171_v39  ;;  %v442_v44 = vpack.c.bf16 %v174_v43, %v173_v42  ;;  %v175_v45 = vld [vmem:[%s674_s5 + $0x60] sm:$0xff]  ;;  %v176_v46 = vld [vmem:[%s674_s5 + $0x68] sm:$0xff]  ;;  %v177_v48 = vld [vmem:[%s674_s5 + $0x70] sm:$0xff] }
   0xf   :  { %v445_v47 = vpack.c.bf16 %v176_v46, %v175_v45  ;;  %v178_v49 = vld [vmem:[%s674_s5 + $0x78] sm:$0xff]  ;;  %v294_v51 = vld [vmem:[%s671_s2] ss:$0 sm:$0xff] }
  0x10   :  { %413 = vmatpush3.bf16.msra.mxu0 %v412_v13  ;;  %v448_v50 = vpack.c.bf16 %v178_v49, %v177_v48  ;;  %v295_v14 = vld [vmem:[%s672_s3] ss:$0 sm:$0xff]  ;;  %s485_s3 = smov [#allocation2]  }
  0x11   :  { %414 = vmatprep.subr.bf16.mxu0 %v482_v3  ;;  %431 = vmatpush3.bf16.msra.mxu1 %v430_v32 }
  0x12   :  { %432 = vmatprep.subr.bf16.mxu1 %v482_v3 }
  0x14   :  { %416 = vmatpush3.bf16.msra.mxu0 %v415_v16  ;;  %v296_v16 = vld [vmem:[%s673_s4] ss:$0 sm:$0xff]  ;;  %s286_s4 = sshll.u32 %s485_s3, 4  ;;  %s287_s4 = int_to_ptr.vmem [resolvable:$true] %s286_s4 }
  0x15   :  { %417 = vmatprep.subr.bf16.mxu0 %v482_v3  ;;  %434 = vmatpush3.bf16.msra.mxu1 %v433_v35  ;;  %p463_p1 = scmp.lt.s32.totalorder %s287_s4, %s287_s4 }
  0x16   :  { %435 = vmatprep.subr.bf16.mxu1 %v482_v3 }
  0x18   :  { %419 = vmatpush3.bf16.msra.mxu0 %v418_v19  ;;  %v297_v19 = vld [vmem:[%s675_s6] ss:$0 sm:$0xff]  ;;  %s458_s6 = scalar_lea.vmem %s287_s4, 32 }
  0x19   :  { %420 = vmatprep.subr.bf16.mxu0 %v482_v3  ;;  %437 = vmatpush3.bf16.msra.mxu1 %v436_v38  ;;  %p459_p0 = scmp.ne.s32.totalorder %s287_s4, %s458_s6  ;;  %p464_p2 = scmp.lt.s32.totalorder %s458_s6, %s458_s6 }
  0x1a   :  { %438 = vmatprep.subr.bf16.mxu1 %v482_v3 }
  0x1b   :  { %p465_p3 = por %p464_p2, %p463_p1 }
  0x1c   :  { %422 = vmatpush3.bf16.msra.mxu0 %v421_v22 }
  0x1d   :  { %423 = vmatprep.subr.bf16.mxu0 %v482_v3  ;;  %440 = vmatpush3.bf16.msra.mxu1 %v439_v41  ;;  %p466_p4 = pnand %p465_p3, %p459_p0 }
  0x1e   :  { %441 = vmatprep.subr.bf16.mxu1 %v482_v3 }
  0x20   :  { %425 = vmatpush3.bf16.msra.mxu0 %v424_v25 }
  0x21   :  { %443 = vmatpush3.bf16.msra.mxu1 %v442_v44 }
  0x22   :  { %444 = vmatprep.subr.bf16.mxu1 %v482_v3 }
  0x23   :  { %365 = vmatmul.mubr.f32.vlgmr.msra.gmra.mrb[0].mxu0 %v27_v26 }
  0x25   :  { %446 = vmatpush3.bf16.msra.mxu1 %v445_v47 }
  0x26   :  { %447 = vmatprep.subr.bf16.mxu1 %v482_v3 }
  0x29   :  { %449 = vmatpush3.bf16.msra.mxu1 %v448_v50 }
  0xf6   :  { %v117_v52 = vpop.f32.mrb[0].mxu0 }
  0xf7   :  { %v118_v53 = vadd.f32 %v294_v51, %v117_v52  ;;  %v366_v54 = vpop.f32.mrb[1].mxu0 }
  0xf9   :  { %v121_v55 = vmax.f32 %v118_v53, 0.0 }
  0xfb   :  { %v123_v56 = vsel %vm122_vm1, %v121_v55, 0.0  ;;  %v132_v57 = vmul.f32 %v121_v55, %v121_v55 }
  0xfc   :  { %v124_v58 = vrot.slane %v123_v56, 4 }
  0xfd   :  { %v133_v59 = vsel %vm122_vm1, %v132_v57, 0.0 }
  0xfe   :  { %v125_v60 = vadd.f32 %v124_v58, %v123_v56  ;;  %v134_v61 = vrot.slane %v133_v59, 4 }
 0x100   :  { %v126_v62 = vrot.slane %v125_v60, 2  ;;  %v135_v63 = vadd.f32 %v134_v61, %v133_v59 }
 0x102   :  { %v127_v0 = vadd.f32 %v126_v62, %v125_v60  ;;  %v136_v1 = vrot.slane %v135_v63, 2 }
 0x104   :  { %v128_v2 = vrot.slane %v127_v0, 1  ;;  %v137_v3 = vadd.f32 %v136_v1, %v135_v63 }
 0x106   :  { %v129_v4 = vadd.f32 %v128_v2, %v127_v0  ;;  %v138_v5 = vrot.slane %v137_v3, 1 }
 0x108   :  { %v131_v6 = vmul.f32 0.5, %v129_v4  ;;  %v139_v7 = vadd.f32 %v138_v5, %v137_v3 }
 0x10a   :  { %v140_v8 = vmul.f32 0.5, %v139_v7  ;;  %v141_v9 = vmul.f32 %v131_v6, %v131_v6  ;;  %v143_v12 = vsub.f32 %v121_v55, %v131_v6 }
 0x10c   :  { %v142_v10 = vsub.f32 %v140_v8, %v141_v9 }
 0x10e   :  { %v144_v11 = vadd.f32 1e-05, %v142_v10 }
 0x110   :  { %454 = vrsqrt.f32 %v144_v11 }
 0x11a   :  { %v455_v13 = vpop.eup %454 }
 0x11b   :  { %v146_v15 = vmul.f32 %v455_v13, %v143_v12 }
 0x11d   :  { %v154_v17 = vmul.f32 %v295_v14, %v146_v15 }
 0x11f   :  { %v162_v18 = vadd.f32 %v296_v16, %v154_v17 }
 0x121   :  { %400 = vmatmul.mubr.f32.vlgmr.msra.gmra.mrb[0].mxu1 %v162_v18 }
 0x1f4   :  { %v252_v20 = vpop.f32.mrb[0].mxu1 }
 0x1f5   :  { %v253_v21 = vadd.f32 %v297_v19, %v252_v20  ;;  %v401_v22 = vpop.f32.mrb[1].mxu1 }
 0x1f7   :  { %v256_v23 = vsel %vm122_vm1, %v253_v21, 0.0  ;;  %v264_v24 = vmul.f32 %v253_v21, %v253_v21 }
 0x1f8   :  { %v257_v25 = vrot.slane %v256_v23, 4 }
 0x1f9   :  { %v265_v26 = vsel %vm122_vm1, %v264_v24, 0.0 }
 0x1fa   :  { %v258_v27 = vadd.f32 %v257_v25, %v256_v23  ;;  %v266_v28 = vrot.slane %v265_v26, 4 }
 0x1fc   :  { %v259_v29 = vrot.slane %v258_v27, 2  ;;  %v267_v30 = vadd.f32 %v266_v28, %v265_v26 }
 0x1fe   :  { %v260_v31 = vadd.f32 %v259_v29, %v258_v27  ;;  %v268_v32 = vrot.slane %v267_v30, 2 }
 0x200   :  { %v269_v33 = vadd.f32 %v268_v32, %v267_v30  ;;  %v261_v34 = vrot.slane %v260_v31, 1 }
 0x202   :  { %v270_v35 = vrot.slane %v269_v33, 1  ;;  %v262_v36 = vadd.f32 %v261_v34, %v260_v31 }
 0x204   :  { %v271_v37 = vadd.f32 %v270_v35, %v269_v33  ;;  %v263_v38 = vmul.f32 0.5, %v262_v36 }
 0x206   :  { %v272_v39 = vmul.f32 0.5, %v271_v37  ;;  %v273_v40 = vmul.f32 %v263_v38, %v263_v38  ;;  %v275_v43 = vsub.f32 %v253_v21, %v263_v38 }
 0x208   :  { %v274_v41 = vsub.f32 %v272_v39, %v273_v40 }
 0x20a   :  { %v276_v42 = vadd.f32 1e-05, %v274_v41 }
 0x20c   :  { %456 = vrsqrt.f32 %v276_v42 }
 0x216   :  { %v457_v44 = vpop.eup %456 }
 0x217   :  { %v278_v45 = vmul.f32 %v457_v44, %v275_v43 }
 0x219   :  { %279 = vst [vmem:[#allocation2] sm:$0x3] %v278_v45 }
 0x21a   :  { %469 = shalt.err (!%p466_p4)
}
 0x21b   :  { %s470_s25 = scalar_lea.hbm %s676_s7, 32 }
 0x21c   :  { %p471_p5 = scmp.ne.s32.totalorder %s676_s7, %s470_s25  ;;  %p474_p6 = scmp.lt.u32.totalorder %s470_s25, %s676_s7 }
 0x21e   :  { %p476_p7 = pnand %p474_p6, %p471_p5 }
 0x220   :  { %479 = shalt.err (!%p476_p7)
}
 0x221   :  { %289 = dma.vmem_to_hbm [thread:$0]  %s287_s4, 32, %s676_s7, [#allocation3]  }
 0x222   :  { %480 = dma.done.wait [#allocation3], 32  }
 0x223   :  { %481 = vsyncadd [#allocation3], 4294967264 }
 0x224   :  { %293 = vsyncpa [#allocation3], 1 }

</bundles_post_ra>
